<compile_context>
chip_gen: v5e
topology: v5e:2x2
jax: 0.10.0
libtpu: 0.0.40
codegen_flags: <defaults>
</compile_context>

<pallas_src>
import functools

import jax
import jax.numpy as jnp
from jax.experimental import pallas as pl
from jax.experimental.pallas import tpu as pltpu


def _rmsnorm_kernel(x_ref, o_ref, *, eps):
    # x_ref block: (NB, C, THW). Reduce over the channel (sublane) axis.
    xf = x_ref[...].astype(jnp.float32)
    ms = jnp.mean(xf * xf, axis=1, keepdims=True)             # (NB, 1, THW) f32
    # PyTorch order: rms = sqrt(mean(x^2)) + eps ; y = x / rms  (eps stays
    # OUTSIDE the sqrt to match the reference module exactly).
    inv = pl.reciprocal(jnp.sqrt(ms) + eps, approx=False)      # EUP slot
    # Multiply in f32, downcast once on store (lane-dense vst).
    o_ref[...] = (xf * inv).astype(o_ref.dtype)


def _vmem_capacity_bytes() -> int:
    """Physical per-core VMEM; conservative v7x default if the query fails."""
    try:
        info = pltpu.get_tpu_info()
        cap = getattr(info, "vmem_capacity_bytes", None)
        if cap:
            return int(cap)
    except Exception:
        pass
    return 64 << 20


def _choose_tiles(N: int, C: int, HW: int, itemsize: int, buffer_budget: int):
    """Pick (NB, THW, n_hw).

    Per-lane-column VMEM cost of a block with NB batch rows:
      2 double-buffered input blocks + 2 output blocks in the input dtype,
      plus ~2 f32 transient copies (xf, xf*xf) inside the kernel body.
    """
    def per_lane(nb: int) -> int:
        return nb * C * (4 * itemsize + 2 * 4)

    # --- lane (HW) tile: as wide as the budget allows, 128-aligned ----------
    max_lanes = max(128, buffer_budget // per_lane(1))
    if HW <= max_lanes:
        thw = HW                                    # full HW dim (always legal)
    else:
        thw = max(128, (max_lanes // 128) * 128)    # ragged last tile is fine
    n_hw = pl.cdiv(HW, thw)

    # --- batch (N) blocking: largest divisor of N that fits the budget ------
    nb = 1
    for cand in range(N, 0, -1):
        if N % cand:
            continue
        if per_lane(cand) * thw > buffer_budget:
            continue
        # Keep >= 2 grid steps when possible (feeds v7x's two TensorCores).
        if cand > 1 and (N // cand) * n_hw < 2:
            continue
        nb = cand
        break
    return nb, thw, n_hw


def simple_rms_norm(x: jax.Array, dim: int = 1, eps: float = 1e-05) -> jax.Array:
    """RMS-normalize over `dim` (channel axis of NCHW). Only dim=1 supported here."""
    assert dim == 1, "kernel implemented for channel-axis (dim=1) reduction"
    N, C, H, W = x.shape
    HW = H * W
    x3 = x.reshape(N, C, HW)

    itemsize = jnp.dtype(x.dtype).itemsize

    # Generation-aware VMEM budgeting: raise the scoped limit explicitly and
    # keep pipeline buffers (+ f32 transients) well under it.
    cap = _vmem_capacity_bytes()                       # 64 MiB v7x, 128 MiB v5e/v6e
    vmem_limit = max(32 << 20, min((cap * 3) // 4, 96 << 20))
    buffer_budget = vmem_limit // 2

    nb, thw, n_hw = _choose_tiles(N, C, HW, itemsize, buffer_budget)
    n_b = N // nb

    kernel = functools.partial(_rmsnorm_kernel, eps=eps)

    cost = pl.CostEstimate(
        flops=3 * N * C * HW,
        transcendentals=2 * N * HW,                    # sqrt + reciprocal per lane col
        bytes_accessed=2 * N * C * HW * itemsize,
    )

    out3 = pl.pallas_call(
        kernel,
        out_shape=jax.ShapeDtypeStruct((N, C, HW), x.dtype),
        grid_spec=pltpu.PrefetchScalarGridSpec(
            num_scalar_prefetch=0,
            grid=(n_b, n_hw),
            in_specs=[pl.BlockSpec((nb, C, thw), lambda n, h: (n, 0, h))],
            out_specs=pl.BlockSpec((nb, C, thw), lambda n, h: (n, 0, h)),
        ),
        compiler_params=pltpu.CompilerParams(
            dimension_semantics=("parallel", "parallel"),
            vmem_limit_bytes=vmem_limit,
        ),
        cost_estimate=cost,
    )(x3)

    return out3.reshape(N, C, H, W)


def _reference(x, dim=1, eps=1e-05):
    rms = jnp.sqrt(jnp.mean(x * x, axis=dim, keepdims=True)) + eps
    return x / rms


if __name__ == "__main__":
    key = jax.random.PRNGKey(0)
    x = jax.random.normal(key, (2, 4, 16, 16), dtype=jnp.float32)

    y = simple_rms_norm(x, dim=1, eps=1e-05)
    y = jax.block_until_ready(y)

    y_ref = _reference(x)
    assert y.shape == x.shape and y.dtype == x.dtype
    assert jnp.allclose(y, y_ref, atol=1e-5, rtol=1e-5), "mismatch vs reference"

    print("KERNEL_OK")
</pallas_src>

<mosaic_0001>
module attributes {stable_mosaic.version = 11 : i64} {
  func.func @_rmsnorm_kernel(%arg0: i32, %arg1: i32, %arg2: memref<1x4x256xf32, #tpu.memory_space<vmem>>, %arg3: memref<1x4x256xf32, #tpu.memory_space<vmem>>) attributes {dimension_semantics = [#tpu.dimension_semantics<parallel>, #tpu.dimension_semantics<parallel>], iteration_bounds = array<i64: 2, 1>, scalar_prefetch = 0 : i64, scratch_operands = 0 : i64, tpu.core_type = #tpu.core_type<tc>, window_params = [{transform_indices = @transform_0, window_bounds = array<i64: 1, 4, 256>}, {transform_indices = @transform_1, window_bounds = array<i64: 1, 4, 256>}]} {
    %c0 = arith.constant 0 : index
    %c0_0 = arith.constant 0 : index
    %c0_1 = arith.constant 0 : index
    %0 = vector.load %arg2[%c0, %c0_0, %c0_1] : memref<1x4x256xf32, #tpu.memory_space<vmem>>, vector<1x4x256xf32>
    %1 = arith.mulf %0, %0 : vector<1x4x256xf32>
    %cst = arith.constant dense<0.000000e+00> : vector<1x256xf32>
    %2 = vector.multi_reduction <add>, %1, %cst [1] : vector<1x4x256xf32> to vector<1x256xf32>
    %3 = vector.shape_cast %2 : vector<1x256xf32> to vector<1x1x256xf32>
    %cst_2 = arith.constant 4.000000e+00 : f32
    %4 = vector.broadcast %cst_2 : f32 to vector<1x1x256xf32>
    %5 = arith.divf %3, %4 : vector<1x1x256xf32>
    %6 = math.sqrt %5 : vector<1x1x256xf32>
    %cst_3 = arith.constant 9.99999974E-6 : f32
    %7 = vector.broadcast %cst_3 : f32 to vector<1x1x256xf32>
    %8 = arith.addf %6, %7 : vector<1x1x256xf32>
    %9 = tpu.reciprocal %8 : vector<1x1x256xf32> -> vector<1x1x256xf32>
    %10 = vector.broadcast %9 : vector<1x1x256xf32> to vector<1x4x256xf32>
    %11 = arith.mulf %0, %10 : vector<1x4x256xf32>
    %c0_4 = arith.constant 0 : index
    %c0_5 = arith.constant 0 : index
    %c0_6 = arith.constant 0 : index
    %12 = vector.load %arg3[%c0_4, %c0_5, %c0_6] : memref<1x4x256xf32, #tpu.memory_space<vmem>>, vector<1x4x256xf32>
    tpu.vector_store %arg3[%c0_4, %c0_5, %c0_6], %11 {strides = array<i32>} : memref<1x4x256xf32, #tpu.memory_space<vmem>>, vector<1x4x256xf32>,
    return
  }
  func.func @transform_0(%arg0: i32, %arg1: i32) -> (i32, i32, i32) {
    %c0_i32 = arith.constant 0 : i32
    %c0_i32_0 = arith.constant 0 : i32
    return %arg0, %c0_i32, %arg1 : i32, i32, i32
  }
  func.func @transform_1(%arg0: i32, %arg1: i32) -> (i32, i32, i32) {
    %c0_i32 = arith.constant 0 : i32
    %c0_i32_0 = arith.constant 0 : i32
    return %arg0, %c0_i32, %arg1 : i32, i32, i32
  }
}

</mosaic_0001>

<bundles_post_ra>
// kernel: tpu_custom_call.1
= control target key start
LH: loop header
LB: loop body
LE: loop exit
PB: predicated region body
PF: predicated region fallthrough
CT: control target
= control target key end

     0   :  { %6 = vsyncpa [#allocation3], 0  ;;  %s704_s0 = inlined_call_operand.hbm [shape: f32[2,4,256], index: 0, kind: input, shape index: {}]   ;;  %s705_s1 = inlined_call_operand.hbm [shape: f32[2,4,256], index: 1, kind: output, shape index: {}]  }
   0x1   :  { %8 = vsyncpa [#allocation3 + $0x1], 0 }
   0x2   :  { %9 = vsyncpa [#allocation4], 0 }
   0x3   :  { %11 = vsyncpa [#allocation4 + $0x1], 0  ;;  %s566_s6 = smov 0   ;;  %s568_s7 = smov 0  }
   0x4   :  { %s570_s8 = smov 0   ;;  %s572_s9 = smov 0  }
   0x5   :  { %s574_s10 = smov 0   ;;  %s576_s11 = smov 0  }
   0x6 LB: > { %s351_s12 = sadd.s32 4294967295, %s553_s11   ;;  %s352_s13 = sadd.s32 4294967294, %s553_s11   ;;  %s553_s11 = sphi %s576_s11, %s17_s11   ;;  %s549_s10 = sphi %s574_s10, %s716_s10   ;;  %s545_s9 = sphi %s572_s9, %s715_s9   ;;  %s541_s8 = sphi %s570_s8, %s714_s8   ;;  %s537_s7 = sphi %s568_s7, %s713_s7   ;;  %s533_s6 = sphi %s566_s6, %s712_s6  }
   0x7   : > { %s29_s14 = sadd.s32 1, %s549_s10  ;;  %s38_s15 = sadd.s32 1, %s541_s8 }
   0x8   : > { %p31_p0 = scmp.ge.s32.totalorder %s29_s14, 2  ;;  %p45_p1 = scmp.ne.s32.totalorder %s541_s8, %s537_s7 }
   0x9   : > { %p46_p2 = scmp.eq.s32.totalorder %s553_s11, 0  ;;  %p51_p3 = scmp.ne.s32.totalorder %s537_s7, %s533_s6 }
   0xa   : > { %s718_s14 = smov (%p31_p0, %s29_s14), 0  ;;  %p52_p5 = scmp.eq.s32.totalorder %s351_s12, 0 }
   0xb   : > { %p607_p4 = por %p46_p2, %p45_p1  ;;  %s33_s17 = ssub.s32 %s549_s10, %s718_s14 }
   0xc   : > { %p77_p6 = scmp.eq.s32.totalorder %s351_s12, 1  ;;  %p36_p7 = scmp.eq.s32.totalorder %s33_s17, 0 }
   0xd   : > { %p613_p8 = por %p52_p5, %p51_p3  ;;  %p83_p10 = scmp.eq.s32.totalorder %s352_s13, 1 }
   0xe   : > { %p617_p9 = por %p77_p6, %p45_p1  ;;  %p354_p12 = scmp.ge.s32.totalorder %s553_s11, 2 }
   0xf   : > { %s622_s20 = scalar_select %p36_p7, %s541_s8, %s38_s15  }
  0x10   : > { %p624_p11 = por %p83_p10, %p51_p3  ;;  %p380_p13 = scmp.lt.s32.totalorder %s553_s11, 2 }
  0x11   : > { %s103_s22 = sand.u32 1, %s541_s8   ;;  %s366_s24 = sshll.u32 %s549_s10, 3 }
  0x12   : > { %s355_s23 = sshll.u32 %s103_s22, 3  ;;  %s114_s27 = scalar_lea.hbm %s704_s0, %s366_s24 }
  0x13   : > { %s107_s28 = scalar_lea.vmem [#allocation2], %s355_s23  ;;  %s116_s30 = sshll.u32 %s114_s27, 4  ;;  %s117_s30 = int_to_ptr.hbm [resolvable:$true] %s116_s30 }
  0x14   : > { %s118_s29 = sshll.u32 %s107_s28, 4  ;;  %p373_p0 = pnand %p380_p13, %p607_p4  ;;  %s119_s29 = int_to_ptr.vmem [resolvable:$true] %s118_s29 }
  0x15   : > { %p358_p1 = scmp.ge.s32.totalorder %s553_s11, 1  ;;  %p123_p2 = scmp.lt.s32.totalorder %s553_s11, 3 }
  0x16   : > { %s104_s2 = scalar_lea.sflag [#allocation3], %s103_s22 }
  0x17   : > { %375 = dma.hbm_to_vmem [thread:$0]  (!%p373_p0), %s117_s30, 128, %s119_s29, %s104_s2  }
  0x18   : > { %p124_p3 = pnand %p358_p1, %p123_p2 }
  0x19   : > { %s640_s3 = sand.u32 (!%p124_p3), 1, %s537_s7  }
  0x1a   : > { %127 = sbr.rel (%p124_p3) target bundleno = 107 (0x6b), region = 24  ;;  %s359_s4 = sshll.u32 (!%p124_p3), %s640_s3, 3 }
  0x1b   : > { %s130_s5 = scalar_lea.sflag (!%p124_p3), [#allocation3], %s640_s3  ;;  %s133_s12 = scalar_lea.vmem (!%p124_p3), [#allocation2], %s359_s4 }
  0x1f   : > { %524 = dma.done.wait (%p613_p8), %s130_s5, 128  }
  0x20   : > { %526 = vsyncadd (%p613_p8), %s130_s5, 4294967168  ;;  %v555_v0 = vmov 4.0   ;;  %v650_v1 = vld [vmem:[%s133_s12] sm:$0xff]  ;;  %vm163_vm0 = vcmask 1043456   ;;  %s367_s13 = sshll.u32 %s545_s9, 3  ;;  %s152_s9 = scalar_lea.vmem [#allocation5], %s359_s4 }
  0x21   : > { %431 = vrcp.f32 %v555_v0  ;;  %v156_v2 = vmul.f32 %v650_v1, %v650_v1  ;;  %s262_s17 = scalar_lea.hbm %s705_s1, %s367_s13  ;;  %s264_s18 = sshll.u32 %s152_s9, 4  ;;  %s265_s18 = int_to_ptr.vmem [resolvable:$true] %s264_s18 }
  0x22   : > { %s266_s22 = sshll.u32 %s262_s17, 4  ;;  %s249_s23 = scalar_lea.sflag [#allocation4], %s640_s3  ;;  %s267_s22 = int_to_ptr.hbm [resolvable:$true] %s266_s22 }
  0x23   : > { %158 = vst [vmem:[#allocation1] ss:$2 sm:$0xff] %v156_v2  ;;  %s485_s24 = sshra.s32 %s267_s22, 4  ;;  %s491_s28 = scalar_lea.hbm %s705_s1, 16  ;;  %s486_s24 = int_to_ptr.hbm [resolvable:$true] %s485_s24 }
  0x24   : > { %s487_s25 = scalar_lea.hbm %s486_s24, 8  ;;  %p492_p7 = scmp.lt.s32.totalorder %s486_s24, %s705_s1 }
  0x25   : > { %p488_p4 = scmp.ne.s32.totalorder %s486_s24, %s487_s25  ;;  %p493_p8 = scmp.lt.s32.totalorder %s491_s28, %s487_s25 }
  0x27   : > { %v432_v3 = vpop.eup %431  ;;  %p489_p5 = pnand %p488_p4, %p617_p9  ;;  %p494_p10 = por %p493_p8, %p492_p7 }
  0x28   : > { %v179_v4 = vmul.f32 4.0, %v432_v3  ;;  %vm183_vm1 = vweird.f32 %v432_v3 }
  0x29   : > { %p490_p6 = pneg %p489_p5 }
  0x2a   : > { %v180_v5 = vsub.f32 1.0, %v179_v4  ;;  %v159_v6 = vld.sshfl [vmem:[#allocation1] sm:$0xff pattern:$0x75316420] }
  0x2b   : > { %v160_v7 = vld.sshfl [vmem:[#allocation1 + $0x8] sm:$0xff pattern:$0x75316420]  ;;  %v164_v8 = vsel %vm163_vm0, %v159_v6, 0.0  ;;  %p495_p13 = pnand %p494_p10, %p490_p6 }
  0x2c   : > { %v171_v9 = vsel %vm163_vm0, %v160_v7, 0.0  ;;  %v165_v10 = vrot.slane %v164_v8, 4  ;;  %v181_v12 = vmul.f32 %v432_v3, %v180_v5 }
  0x2d   : > { %v172_v11 = vrot.slane %v171_v9, 4 }
  0x2e   : > { %v166_v13 = vadd.f32 %v165_v10, %v164_v8  ;;  %v182_v17 = vadd.f32 %v432_v3, %v181_v12 }
  0x2f   : > { %v173_v14 = vadd.f32 %v172_v11, %v171_v9 }
  0x30   : > { %v167_v15 = vrot.slane %v166_v13, 2  ;;  %v184_v22 = vsel %vm183_vm1, %v432_v3, %v182_v17 }
  0x31   : > { %v174_v16 = vrot.slane %v173_v14, 2 }
  0x32   : > { %v168_v18 = vadd.f32 %v167_v15, %v166_v13 }
  0x33   : > { %v175_v19 = vadd.f32 %v174_v16, %v173_v14 }
  0x34   : > { %v169_v20 = vrot.slane %v168_v18, 1 }
  0x35   : > { %v176_v21 = vrot.slane %v175_v19, 1 }
  0x36   : > { %v170_v23 = vadd.f32 %v169_v20, %v168_v18 }
  0x37   : > { %v177_v24 = vadd.f32 %v176_v21, %v175_v19 }
  0x38   : > { %v185_v25 = vmul.f32 %v184_v22, %v170_v23 }
  0x39   : > { %v186_v26 = vmul.f32 %v184_v22, %v177_v24 }
  0x3a   : > { %433 = vrsqrt.f32 %v185_v25  ;;  %vm194_vm2 = vcmp.eq.f32.partialorder %v185_v25, inf  ;;  %v197_v40 = vand.u32 2147483648, %v185_v25  ;;  %vm196_vm3 = vcmp.eq.f32.partialorder %v185_v25, 0.0 }
  0x3b   : > { %435 = vrsqrt.f32 %v186_v26  ;;  %vm206_vm4 = vcmp.eq.f32.partialorder %v186_v26, inf  ;;  %v209_v43 = vand.u32 2147483648, %v186_v26  ;;  %vm208_vm5 = vcmp.eq.f32.partialorder %v186_v26, 0.0 }
  0x40   : > { %v434_v27 = vpop.eup %433 }
  0x41   : > { %v436_v28 = vpop.eup %435  ;;  %v188_v29 = vmul.f32 %v434_v27, %v185_v25 }
  0x42   : > { %v200_v30 = vmul.f32 %v436_v28, %v186_v26 }
  0x43   : > { %v189_v31 = vmul.f32 %v434_v27, %v188_v29 }
  0x44   : > { %v201_v32 = vmul.f32 %v436_v28, %v200_v30 }
  0x45   : > { %v190_v33 = vmul.f32 0.5, %v189_v31 }
  0x46   : > { %v202_v34 = vmul.f32 0.5, %v201_v32 }
  0x47   : > { %v191_v35 = vsub.f32 1.5, %v190_v33 }
  0x48   : > { %v203_v36 = vsub.f32 1.5, %v202_v34 }
  0x49   : > { %v192_v37 = vmul.f32 %v434_v27, %v191_v35 }
  0x4a   : > { %v204_v38 = vmul.f32 %v436_v28, %v203_v36 }
  0x4b   : > { %v193_v39 = vmul.f32 %v192_v37, %v185_v25 }
  0x4c   : > { %v205_v41 = vmul.f32 %v204_v38, %v186_v26 }
  0x4d   : > { %v195_v42 = vsel %vm194_vm2, %v185_v25, %v193_v39 }
  0x4e   : > { %v198_v44 = vsel %vm196_vm3, %v197_v40, %v195_v42  ;;  %v207_v45 = vsel %vm206_vm4, %v186_v26, %v205_v41 }
  0x4f   : > { %v210_v46 = vsel %vm208_vm5, %v209_v43, %v207_v45  ;;  %v211_v47 = vadd.f32 1e-05, %v198_v44 }
  0x50   : > { %v212_v48 = vadd.f32 1e-05, %v210_v46 }
  0x51   : > { %437 = vrcp.f32 %v211_v47  ;;  %vm218_vm8 = vweird.f32 %v211_v47  ;;  %v224_v60 = vand.u32 2147483648, %v211_v47  ;;  %v222_v62 = vand.u32 2147483647, %v211_v47 }
  0x52   : > { %439 = vrcp.f32 %v212_v48  ;;  %v238_v56 = vand.u32 2147483648, %v212_v48  ;;  %v236_v58 = vand.u32 2147483647, %v212_v48  ;;  %vm232_vm10 = vweird.f32 %v212_v48 }
  0x53   : > { %v225_v4 = vor.u32 1.1754944e-38, %v224_v60  ;;  %vm223_vm13 = vcmp.eq.f32.partialorder %v222_v62, 8.507059e+37 }
  0x54   : > { %v239_v0 = vor.u32 1.1754944e-38, %v238_v56  ;;  %vm237_vm12 = vcmp.eq.f32.partialorder %v236_v58, 8.507059e+37 }
  0x57   : > { %v438_v49 = vpop.eup %437 }
  0x58   : > { %v440_v50 = vpop.eup %439  ;;  %v214_v51 = vmul.f32 %v438_v49, %v211_v47  ;;  %vm219_vm6 = vweird.f32 %v438_v49 }
  0x59   : > { %v228_v52 = vmul.f32 %v440_v50, %v212_v48  ;;  %vm233_vm7 = vweird.f32 %v440_v50  ;;  %vm657_vm9 = vmor %vm218_vm8, %vm219_vm6 }
  0x5a   : > { %v215_v53 = vsub.f32 1.0, %v214_v51  ;;  %vm234_vm11 = vmor %vm232_vm10, %vm233_vm7 }
  0x5b   : > { %v229_v54 = vsub.f32 1.0, %v228_v52 }
  0x5c   : > { %v216_v55 = vmul.f32 %v438_v49, %v215_v53 }
  0x5d   : > { %v230_v57 = vmul.f32 %v440_v50, %v229_v54 }
  0x5e   : > { %v217_v59 = vadd.f32 %v438_v49, %v216_v55 }
  0x5f   : > { %v231_v63 = vadd.f32 %v440_v50, %v230_v57 }
  0x60   : > { %v221_v2 = vsel %vm657_vm9, %v438_v49, %v217_v59 }
  0x61   : > { %v235_v3 = vsel %vm234_vm11, %v440_v50, %v231_v63  ;;  %v226_v7 = vsel %vm223_vm13, %v225_v4, %v221_v2 }
  0x62   : > { %v240_v5 = vsel %vm237_vm12, %v239_v0, %v235_v3 }
  0x63   : > { %v243_v6 = vrot.slane %v240_v5, 4 }
  0x65   : > { %v244_v8 = vsel %vm163_vm0, %v226_v7, %v243_v6 }
  0x66   : > { %v246_v9 = vmul.f32 %v244_v8, %v650_v1 }
  0x68   : > { %247 = vst [vmem:[%s152_s9] sm:$0xff] %v246_v9 }
  0x69   : > { %498 = shalt.err (!%p495_p13)
}
  0x6a   : > { %370 = dma.vmem_to_hbm [thread:$0]  (%p617_p9), %s265_s18, 128, %s267_s22, %s249_s23  }
  0x6b PF: > { %s278_s2 = sand.u32 1, %s533_s6   ;;  %p377_p0 = pnand %p354_p12, %p624_p11 }
  0x6c   : > { %s279_s3 = scalar_lea.sflag [#allocation4], %s278_s2 }
  0x6d   : > { %p378_p1 = pneg %p377_p0 }
  0x6f   : > { %528 = dma.done.wait (%p378_p1), %s279_s3, 128  }
  0x70   : > { %530 = vsyncadd (%p378_p1), %s279_s3, 4294967168  ;;  %s17_s11 = sadd.s32 1, %s553_s11   ;;  %s712_s6 = smov %s537_s7 }
  0x71   : > { %p14_p2 = scmp.ge.s32.totalorder %s17_s11, 4   ;;  %s713_s7 = smov %s541_s8 }
  0x72   : > { %s714_s8 = smov %s622_s20  ;;  %s715_s9 = smov %s549_s10 }
  0x73   : > { %s716_s10 = smov %s718_s14  ;;  %16 = sbr.rel (!%p14_p2) target bundleno = 6 (0x6), region = 69 }
  0x78   :  { %285 = vsyncpa [#allocation3], 1 }
  0x79   :  { %287 = vsyncpa [#allocation3 + $0x1], 1 }
  0x7a   :  { %288 = vsyncpa [#allocation4], 1 }
  0x7b   :  { %290 = vsyncpa [#allocation4 + $0x1], 1 }

</bundles_post_ra>
